<compile_context>
chip_gen: v7x
topology: tpu7x:2x2x1
jax: 0.10.0
libtpu: 0.0.40
codegen_flags: <defaults>
</compile_context>

<pallas_src>
import functools

import jax
import jax.numpy as jnp
from jax.experimental import pallas as pl
from jax.experimental.pallas import tpu as pltpu

_LANES = 128                 # TPU lane width (last-dim tiling unit)
_MAX_HW_TILE = 2048          # initial lane-tile cap (grown when R fits one row tile)
_MAX_R_TILE = 8192           # row-tile cap (keeps scratch / output blocks a few MiB)
_MIN_PALLAS_BYTES = 1 << 20  # below this, plain fused XLA reductions win


def _round_up(x, m):
    return (x + m - 1) // m * m


def _vmem_params():
    """Return (per-buffer input budget, vmem_limit_bytes, ensure_two_row_tiles)."""
    try:
        cap = pltpu.get_tpu_info().vmem_capacity_bytes
    except Exception:
        cap = None
    if cap is None or cap <= (96 << 20):
        # v7x-class: 64 MiB physical VMEM per TC, 2 TensorCores/chip.
        return 8 << 20, 44 << 20, True
    # v5e / v6e: 128 MiB physical VMEM, 1 TensorCore/chip.
    return 12 << 20, 64 << 20, False


def _choose_tiles(R, HW, itemsize, budget, ensure_two_row_tiles):
    """Pick (r_tile, hw_tile) so the double-buffered input block fills `budget`."""
    sub = max(8, 32 // itemsize)              # 8 rows for f32, 16 for bf16
    r_full = _round_up(R, sub)
    hw_full = _round_up(HW, _LANES)

    hw_tile = min(hw_full, _MAX_HW_TILE)
    r_budget = max(sub, (budget // (hw_tile * itemsize)) // sub * sub)
    r_tile = min(r_budget, _MAX_R_TILE, r_full)

    # If one row tile already covers R, spend leftover budget on wider HW
    # blocks instead (fewer grid steps -> less fixed per-step overhead).
    if r_tile == r_full and hw_tile < hw_full:
        hw_budget = max(_LANES, (budget // (r_tile * itemsize)) // _LANES * _LANES)
        hw_tile = min(hw_full, max(hw_tile, hw_budget))

    # v7x: guarantee >=2 tiles on the "parallel" row axis so both TensorCores
    # get work; only worth it while blocks stay >= ~1 MiB.
    if ensure_two_row_tiles and pl.cdiv(R, r_tile) < 2 and R > sub:
        half = _round_up(pl.cdiv(R, 2), sub)
        if half * hw_tile * itemsize >= (1 << 20):
            r_tile = half

    return r_tile, hw_tile


def _concat_pool_kernel(x_ref, out_ref, max_acc, sum_acc, *, hw, hw_tile,
                        use_mxu_sum):
    """Grid = (row tiles, HW tiles); HW (last axis) is the reduction."""
    k = pl.program_id(1)
    nk = pl.num_programs(1)

    @pl.when(k == 0)
    def _init():
        max_acc[...] = jnp.full_like(max_acc, -jnp.inf)
        sum_acc[...] = jnp.zeros_like(sum_acc)

    rem = hw % hw_tile  # static; > 0 only when the last HW tile is partial

    def _full_update():
        # Fast path: no lane masking on full tiles (keeps the steady state
        # HBM-bound instead of VALU-bound).
        x = x_ref[...]                                    # (r_tile, hw_tile)
        max_acc[...] = jnp.maximum(
            max_acc[...],
            jnp.max(x, axis=-1, keepdims=True).astype(jnp.float32))
        if use_mxu_sum:
            # Sum on the otherwise-idle MXU (bf16 inputs, f32 accumulate);
            # avoids materialising an f32 copy of the tile on the VPU.
            ones = jnp.ones((hw_tile, 1), dtype=x.dtype)
            sum_acc[...] += jnp.dot(x, ones, preferred_element_type=jnp.float32)
        else:
            sum_acc[...] += jnp.sum(x.astype(jnp.float32), axis=-1, keepdims=True)

    def _partial_update():
        # Last (padded) HW tile only.  OOB lanes may hold arbitrary (even
        # non-finite) data, so mask x itself for both reductions.
        x = x_ref[...]
        col = jax.lax.broadcasted_iota(jnp.int32, x.shape, 1)
        valid = col < rem
        xm = jnp.where(valid, x, jnp.asarray(-jnp.inf, x.dtype))
        max_acc[...] = jnp.maximum(
            max_acc[...],
            jnp.max(xm, axis=-1, keepdims=True).astype(jnp.float32))
        xs = jnp.where(valid, x.astype(jnp.float32), 0.0)
        sum_acc[...] += jnp.sum(xs, axis=-1, keepdims=True)

    if rem == 0:
        _full_update()
    else:
        pl.when(k < nk - 1)(_full_update)
        pl.when(k == nk - 1)(_partial_update)

    @pl.when(k == nk - 1)
    def _finalize():
        mean = sum_acc[...] * (1.0 / hw)
        # Single packed store (one vst per row tile instead of two 1-lane ones).
        out_ref[...] = jnp.concatenate([max_acc[...], mean],
                                       axis=-1).astype(out_ref.dtype)


def _pooled_2col(x2d, R, HW, r_tile, hw_tile, vmem_limit, use_mxu_sum):
    grid = (pl.cdiv(R, r_tile), pl.cdiv(HW, hw_tile))
    kernel = functools.partial(_concat_pool_kernel, hw=HW, hw_tile=hw_tile,
                               use_mxu_sum=use_mxu_sum)
    # TODO(synk): a fully lane-dense (2, R) packed output would need an
    # in-kernel sublane->lane relayout; the output stream is ~HW/2x smaller
    # than the input, so it stays sublane-oriented and is repacked by cheap
    # wrapper-side reshapes.
    return pl.pallas_call(
        kernel,
        out_shape=jax.ShapeDtypeStruct((R, 2), x2d.dtype),
        grid_spec=pltpu.PrefetchScalarGridSpec(
            num_scalar_prefetch=0,
            grid=grid,
            in_specs=[pl.BlockSpec((r_tile, hw_tile), lambda i, k: (i, k))],
            out_specs=pl.BlockSpec((r_tile, 2), lambda i, k: (i, 0)),
            scratch_shapes=[
                pltpu.VMEM((r_tile, 1), jnp.float32),   # running max
                pltpu.VMEM((r_tile, 1), jnp.float32),   # running sum
            ],
        ),
        compiler_params=pltpu.CompilerParams(
            dimension_semantics=("parallel", "arbitrary"),
            vmem_limit_bytes=vmem_limit,
        ),
    )(x2d)


def adaptive_concat_pool2d(x, *, use_pallas=None, tile_override=None):
    """x: (N, C, H, W) -> (N, 2*C, 1, 1), matching PyTorch AdaptiveConcatPool2d."""
    N, C, H, W = x.shape
    R, HW = N * C, H * W
    is_float = jnp.issubdtype(x.dtype, jnp.floating)
    itemsize = jnp.dtype(x.dtype).itemsize

    if use_pallas is None:
        # Tiny inputs (per-step overhead dominates) and HW < 128 (>50% of each
        # vreg would be lane padding) use fused XLA reductions.
        use_pallas = (is_float and R * HW * itemsize >= _MIN_PALLAS_BYTES
                      and HW >= _LANES)

    if not use_pallas or not is_float:
        # Non-float dtypes: the Pallas path assumes floating point (-inf
        # sentinel, 1/HW scaling); fall back to XLA.
        mx = jnp.max(x, axis=(2, 3), keepdims=True)
        av = jnp.mean(x, axis=(2, 3), keepdims=True).astype(x.dtype)
        return jnp.concatenate([mx, av], axis=1)

    x2d = x.reshape(R, HW)
    budget, vmem_limit, two_row_tiles = _vmem_params()
    r_tile, hw_tile = _choose_tiles(R, HW, itemsize, budget, two_row_tiles)
    if tile_override is not None:          # testing hook
        r_tile, hw_tile = tile_override

    # MXU sum path only pays off (and keeps f32 accuracy) for bf16 inputs.
    use_mxu_sum = x2d.dtype == jnp.bfloat16
    try:
        out = _pooled_2col(x2d, R, HW, r_tile, hw_tile, vmem_limit, use_mxu_sum)
    except Exception:
        if not use_mxu_sum:
            raise
        # Robustness fallback: retry with the plain VPU sum path.
        out = _pooled_2col(x2d, R, HW, r_tile, hw_tile, vmem_limit, False)

    # (N*C, 2) -> (N, 2*C, 1, 1); channels 0..C-1 = max, C..2C-1 = avg,
    # exactly like torch.cat([max, avg], dim=1).
    out = out.reshape(N, C, 2, 1, 1).transpose(0, 2, 1, 3, 4)
    return out.reshape(N, 2 * C, 1, 1)


def _reference(x):
    xf = x.astype(jnp.float32)
    mx = jnp.max(xf, axis=(2, 3), keepdims=True)
    av = jnp.mean(xf, axis=(2, 3), keepdims=True)
    return jnp.concatenate([mx, av], axis=1).astype(x.dtype)


if __name__ == "__main__":
    k0, k1, k2 = jax.random.split(jax.random.PRNGKey(0), 3)

    # 1) Primary shape from the module spec (force the Pallas path).
    x1 = jax.random.normal(k0, (2, 4, 16, 16), dtype=jnp.float32)
    out1 = jax.block_until_ready(adaptive_concat_pool2d(x1, use_pallas=True))
    assert out1.shape == (2, 8, 1, 1), out1.shape
    assert jnp.allclose(out1, _reference(x1), atol=1e-5, rtol=1e-5)

    # Auto path (tiny input -> fused XLA bypass) must agree too.
    out1b = jax.block_until_ready(adaptive_concat_pool2d(x1))
    assert jnp.allclose(out1b, _reference(x1), atol=1e-5, rtol=1e-5)

    # 2) Larger spatial extent with the default (budget-filling) tiling.
    x2 = jax.random.normal(k1, (1, 8, 48, 48), dtype=jnp.float32)
    out2 = jax.block_until_ready(adaptive_concat_pool2d(x2, use_pallas=True))
    assert out2.shape == (1, 16, 1, 1), out2.shape
    assert jnp.allclose(out2, _reference(x2), atol=1e-5, rtol=1e-5)

    # 3) Force the multi-step HW reduction + gated last-step lane mask
    #    (HW=2304, hw_tile=1024 -> 3 steps, rem=256).
    out2b = jax.block_until_ready(
        adaptive_concat_pool2d(x2, use_pallas=True, tile_override=(8, 1024)))
    assert jnp.allclose(out2b, _reference(x2), atol=1e-5, rtol=1e-5)

    # 4) bf16: max in native dtype, sum on the MXU with f32 accumulation.
    x3 = jax.random.normal(k2, (2, 4, 16, 16), dtype=jnp.float32).astype(jnp.bfloat16)
    out3 = jax.block_until_ready(adaptive_concat_pool2d(x3, use_pallas=True))
    assert out3.shape == (2, 8, 1, 1), out3.shape
    assert jnp.allclose(out3.astype(jnp.float32), _reference(x3).astype(jnp.float32),
                        atol=1e-2, rtol=1e-2)

    # 5) bf16 with multi-step reduction + partial last tile (MXU full path +
    #    masked VPU last step).
    x4 = x2.astype(jnp.bfloat16)
    out4 = jax.block_until_ready(
        adaptive_concat_pool2d(x4, use_pallas=True, tile_override=(16, 1024)))
    assert out4.shape == (1, 16, 1, 1), out4.shape
    assert jnp.allclose(out4.astype(jnp.float32), _reference(x4).astype(jnp.float32),
                        atol=1e-2, rtol=1e-2)

    print("KERNEL_OK")
</pallas_src>

<mosaic_0001>
module attributes {stable_mosaic.version = 11 : i64} {
  func.func @_concat_pool_kernel(%arg0: i32, %arg1: i32, %arg2: memref<8x256xf32, #tpu.memory_space<vmem>>, %arg3: memref<8x2xf32, #tpu.memory_space<vmem>>, %arg4: memref<8x1xf32, #tpu.memory_space<vmem>>, %arg5: memref<8x1xf32, #tpu.memory_space<vmem>>) attributes {dimension_semantics = [#tpu.dimension_semantics<parallel>, #tpu.dimension_semantics<arbitrary>], iteration_bounds = array<i64: 1, 1>, scalar_prefetch = 0 : i64, scratch_operands = 2 : i64, tpu.core_type = #tpu.core_type<tc>, window_params = [{transform_indices = @transform_0, window_bounds = array<i64: 8, 256>}, {transform_indices = @transform_1, window_bounds = array<i64: 8, 2>}]} {
    %c0_i32 = arith.constant 0 : i32
    %0 = arith.cmpi eq, %arg1, %c0_i32 : i32
    %1 = arith.extui %0 : i1 to i32
    %c0_i32_0 = arith.constant 0 : i32
    %2 = arith.cmpi ne, %1, %c0_i32_0 : i32
    scf.if %2 {
      %cst_13 = arith.constant 0xFF800000 : f32
      %17 = vector.broadcast %cst_13 : f32 to vector<8x1xf32>
      %c0_14 = arith.constant 0 : index
      %c0_15 = arith.constant 0 : index
      %18 = vector.load %arg4[%c0_14, %c0_15] : memref<8x1xf32, #tpu.memory_space<vmem>>, vector<8x1xf32>
      tpu.vector_store %arg4[%c0_14, %c0_15], %17 {strides = array<i32>} : memref<8x1xf32, #tpu.memory_space<vmem>>, vector<8x1xf32>,
      %cst_16 = arith.constant 0.000000e+00 : f32
      %19 = vector.broadcast %cst_16 : f32 to vector<8x1xf32>
      %c0_17 = arith.constant 0 : index
      %c0_18 = arith.constant 0 : index
      %20 = vector.load %arg5[%c0_17, %c0_18] : memref<8x1xf32, #tpu.memory_space<vmem>>, vector<8x1xf32>
      tpu.vector_store %arg5[%c0_17, %c0_18], %19 {strides = array<i32>} : memref<8x1xf32, #tpu.memory_space<vmem>>, vector<8x1xf32>,
    } else {
    }
    %c0 = arith.constant 0 : index
    %c0_1 = arith.constant 0 : index
    %3 = vector.load %arg2[%c0, %c0_1] : memref<8x256xf32, #tpu.memory_space<vmem>>, vector<8x256xf32>
    %c0_2 = arith.constant 0 : index
    %c0_3 = arith.constant 0 : index
    %4 = vector.load %arg4[%c0_2, %c0_3] : memref<8x1xf32, #tpu.memory_space<vmem>>, vector<8x1xf32>
    %cst = arith.constant dense<0xFF800000> : vector<8xf32>
    %5 = vector.multi_reduction <maximumf>, %3, %cst [1] : vector<8x256xf32> to vector<8xf32>
    %6 = vector.shape_cast %5 : vector<8xf32> to vector<8x1xf32>
    %7 = arith.maximumf %4, %6 : vector<8x1xf32>
    %c0_4 = arith.constant 0 : index
    %c0_5 = arith.constant 0 : index
    %8 = vector.load %arg4[%c0_4, %c0_5] : memref<8x1xf32, #tpu.memory_space<vmem>>, vector<8x1xf32>
    tpu.vector_store %arg4[%c0_4, %c0_5], %7 {strides = array<i32>} : memref<8x1xf32, #tpu.memory_space<vmem>>, vector<8x1xf32>,
    %c0_6 = arith.constant 0 : index
    %c0_7 = arith.constant 0 : index
    %9 = vector.load %arg5[%c0_6, %c0_7] : memref<8x1xf32, #tpu.memory_space<vmem>>, vector<8x1xf32>
    %cst_8 = arith.constant dense<0.000000e+00> : vector<8xf32>
    %10 = vector.multi_reduction <add>, %3, %cst_8 [1] : vector<8x256xf32> to vector<8xf32>
    %11 = vector.shape_cast %10 : vector<8xf32> to vector<8x1xf32>
    %12 = arith.addf %9, %11 : vector<8x1xf32>
    %c0_9 = arith.constant 0 : index
    %c0_10 = arith.constant 0 : index
    %13 = vector.load %arg5[%c0_9, %c0_10] : memref<8x1xf32, #tpu.memory_space<vmem>>, vector<8x1xf32>
    tpu.vector_store %arg5[%c0_9, %c0_10], %12 {strides = array<i32>} : memref<8x1xf32, #tpu.memory_space<vmem>>, vector<8x1xf32>,
    %c0_i32_11 = arith.constant 0 : i32
    %14 = arith.cmpi eq, %arg1, %c0_i32_11 : i32
    %15 = arith.extui %14 : i1 to i32
    %c0_i32_12 = arith.constant 0 : i32
    %16 = arith.cmpi ne, %15, %c0_i32_12 : i32
    scf.if %16 {
      %c0_13 = arith.constant 0 : index
      %c0_14 = arith.constant 0 : index
      %17 = vector.load %arg5[%c0_13, %c0_14] : memref<8x1xf32, #tpu.memory_space<vmem>>, vector<8x1xf32>
      %cst_15 = arith.constant 3.906250e-03 : f32
      %18 = vector.broadcast %cst_15 : f32 to vector<8x1xf32>
      %19 = arith.mulf %17, %18 : vector<8x1xf32>
      %c0_16 = arith.constant 0 : index
      %c0_17 = arith.constant 0 : index
      %20 = vector.load %arg4[%c0_16, %c0_17] : memref<8x1xf32, #tpu.memory_space<vmem>>, vector<8x1xf32>
      %21 = tpu.concatenate %20, %19 in 1 : vector<8x1xf32>, vector<8x1xf32> -> vector<8x2xf32>
      %c0_18 = arith.constant 0 : index
      %c0_19 = arith.constant 0 : index
      %22 = vector.load %arg3[%c0_18, %c0_19] : memref<8x2xf32, #tpu.memory_space<vmem>>, vector<8x2xf32>
      tpu.vector_store %arg3[%c0_18, %c0_19], %21 {strides = array<i32>} : memref<8x2xf32, #tpu.memory_space<vmem>>, vector<8x2xf32>,
    } else {
    }
    return
  }
  func.func @transform_0(%arg0: i32, %arg1: i32) -> (i32, i32) {
    %c0_i32 = arith.constant 0 : i32
    return %arg0, %arg1 : i32, i32
  }
  func.func @transform_1(%arg0: i32, %arg1: i32) -> (i32, i32) {
    %c0_i32 = arith.constant 0 : i32
    %c0_i32_0 = arith.constant 0 : i32
    return %arg0, %c0_i32 : i32, i32
  }
}

</mosaic_0001>

<bundles_post_ra>
// kernel: tpu_custom_call.1
= control target key start
LH: loop header
LB: loop body
LE: loop exit
PB: predicated region body
PF: predicated region fallthrough
CT: control target
= control target key end

     0   :  { %6 = vsyncpa [#allocation5], 0  ;;  %s88_s6 = smov [#allocation4]   ;;  %s122_s0 = inlined_call_operand.hbm [shape: f32[8,256], index: 0, kind: input, shape index: {}]   ;;  %s123_s1 = inlined_call_operand.vmem [shape: f32[8,2], index: 1, kind: output, shape index: {}]  }
   0x1   :  { %s13_s7 = sshll.u32 %s88_s6, 4  ;;  %s64_s10 = scalar_lea.hbm %s122_s0, 256  ;;  %s14_s7 = int_to_ptr.vmem [resolvable:$true] %s13_s7 }
   0x2   :  { %p65_p0 = scmp.ne.s32.totalorder %s122_s0, %s64_s10  ;;  %p68_p1 = scmp.lt.u32.totalorder %s64_s10, %s122_s0 }
   0x4   :  { %p70_p2 = pnand %p68_p1, %p65_p0 }
   0x6   :  { %73 = shalt.err (!%p70_p2)
}
   0x7   :  { %s74_s15 = scalar_lea.vmem %s14_s7, 256  ;;  %p79_p4 = scmp.lt.s32.totalorder %s14_s7, %s14_s7 }
   0x8   :  { %p75_p3 = scmp.ne.s32.totalorder %s14_s7, %s74_s15  ;;  %p80_p5 = scmp.lt.s32.totalorder %s74_s15, %s74_s15 }
   0xa   :  { %p81_p6 = por %p80_p5, %p79_p4 }
   0xc   :  { %p82_p7 = pnand %p81_p6, %p75_p3 }
   0xe   :  { %85 = shalt.err (!%p82_p7)
}
   0xf   :  { %16 = dma.hbm_to_vmem [thread:$0]  %s122_s0, 256, %s14_s7, [#allocation5]  }
  0x10   :  { %86 = dma.done.wait [#allocation5], 256  }
  0x11   :  { %87 = vsyncadd [#allocation5], 4294967040  ;;  %vm24_vm0 = vcmask 7168   ;;  %v89_v0 = vmov 0.0   ;;  %v27_v1 = vld [vmem:[#allocation4] sm:$0xff]  ;;  %v28_v2 = vld [vmem:[#allocation4 + $0x8] sm:$0xff] }
  0x12   :  { %26 = vst.msk [vmem:[#allocation3] sm:$0xff] %vm24_vm0, %v89_v0  ;;  %v37_v3 = vadd.f32 %v28_v2, %v27_v1  ;;  %v30_v4 = vmax.f32 %v27_v1, %v28_v2  ;;  %v90_v5 = vmov -inf   ;;  %s91_s0 = smov 1   ;;  %vm53_vm1 = vcmask 15360  }
  0x13   :  { %25 = vst.msk [vmem:[#allocation2] sm:$0xff] %vm24_vm0, %v90_v5 }
  0x14   :  { %38 = vadd.xlane.f32.xlu0 %v37_v3 }
  0x18   :  { %31 = vmax.xlane.f32.xlu0 %v30_v4 }
  0x19   :  { %v36_v6 = vld [vmem:[#allocation3] sm:$0xff] }
  0x1a   :  { %v29_v9 = vld [vmem:[#allocation2] sm:$0xff] }
  0xa1   :  { %v39_v7 = vpop.xlane.xlu0 %38 }
  0xa2   :  { %v40_v8 = vadd.f32 %v39_v7, %v36_v6 }
  0xa4   :  { %41 = vst.msk [vmem:[#allocation3] sm:$0xff] %vm24_vm0, %v40_v8 }
  0xa5   :  { %v32_v10 = vpop.xlane.xlu0 %31 }
  0xa6   :  { %v33_v11 = vmax.f32 %v29_v9, %v32_v10 }
  0xa8   :  { %35 = vst.msk [vmem:[#allocation2] sm:$0xff] %vm24_vm0, %v33_v11 }
  0xab   :  { %v45_v12 = vld [vmem:[#allocation3] sm:$0xff] }
  0xac   :  { %v46_v13 = vmul.f32 0.00390625, %v45_v12 }
  0xae   :  { %49 = vrot.lane.b32.xlu1 %v46_v13, %s91_s0 }
  0xaf   :  { %v47_v14 = vld [vmem:[#allocation2] sm:$0xff] }
 0x120   :  { %v50_v15 = vpop.permute.xlu1 %49 }
 0x121   :  { %v52_v16 = vsel %vm24_vm0, %v47_v14, %v50_v15 }
 0x122   :  { %54 = vst.msk [vmem:[%s123_s1] sm:$0xff] %vm53_vm1, %v52_v16 }
 0x123   :  { %59 = vsyncpa [#allocation5], 1 }

</bundles_post_ra>
